<compile_context>
chip_gen: v6e
topology: v6e:2x2x1
jax: 0.10.0
libtpu: 0.0.40
codegen_flags: <defaults>
</compile_context>

<pallas_src>
import jax
import jax.numpy as jnp
from jax.experimental import pallas as pl
from jax.experimental.pallas import tpu as pltpu


def _round_up(x, m):
    return (x + m - 1) // m * m


# ----------------------------------------------------------------------------
# Fused kernel: per grid step, one (TM, 1) tile of token ids
#   1) one-hot(ids) @ table  -> (TM, Dp) embedding tile   (MXU, f32 acc)
#   2) emb @ W + b, ReLU     -> (TM, Hp) network tile     (MXU, f32 acc)
# Both tiles are written out lane-dense (Dp, Hp multiples of 128).
# ----------------------------------------------------------------------------
def _fused_embed_linear_relu_kernel(ids_ref, table_ref, w_ref, b_ref,
                                    emb_ref, net_ref):
    tm = ids_ref.shape[0]
    vp = table_ref.shape[0]

    ids = ids_ref[...]                                        # (TM, 1) int32
    vocab_iota = jax.lax.broadcasted_iota(jnp.int32, (tm, vp), 1)
    # Lane-broadcast compare: (TM, Vp) == (TM, 1) -> one-hot rows.
    onehot = (vocab_iota == ids).astype(table_ref.dtype)      # (TM, Vp)

    # Embedding gather on the MXU: one-hot @ resident table.
    emb = jnp.dot(onehot, table_ref[...],
                  preferred_element_type=jnp.float32)         # (TM, Dp)
    emb_ref[...] = emb.astype(emb_ref.dtype)

    # Fused Linear + bias + ReLU epilogue (no extra store pass).
    y = jnp.dot(emb, w_ref[...],
                preferred_element_type=jnp.float32) + b_ref[...]
    net_ref[...] = jnp.maximum(y, 0.0).astype(net_ref.dtype)


# ----------------------------------------------------------------------------
# EmbedderNetwork forward
# ----------------------------------------------------------------------------
def embedder_network_forward(x_ids, table, w, b, *, tm=128):
    """x_ids: (B, S) int32 -> (embedded (B,S,D), network_out (B,S,H))."""
    bsz, seq = x_ids.shape
    vocab, emb_dim = table.shape
    d_in, hid = w.shape
    assert d_in == emb_dim
    n_tok = bsz * seq

    # Padded, lane-dense problem sizes.
    dp = _round_up(emb_dim, 128)          # feature dim -> multiple of 128
    hp = _round_up(hid, 128)              # hidden dim  -> multiple of 128
    vp = _round_up(vocab, 8)              # vocab rows  -> multiple of 8
    n_pad = _round_up(n_tok, tm)          # token rows  -> multiple of TM

    ids_flat = x_ids.reshape(-1).astype(jnp.int32)
    ids_p = jnp.zeros((n_pad, 1), jnp.int32).at[:n_tok, 0].set(ids_flat)
    table_p = jnp.zeros((vp, dp), table.dtype).at[:vocab, :emb_dim].set(table)
    w_p = jnp.zeros((dp, hp), w.dtype).at[:emb_dim, :hid].set(w)
    b_p = jnp.zeros((1, hp), b.dtype).at[0, :hid].set(b)

    grid = (n_pad // tm,)

    # VMEM footprint: double-buffered ids + outputs, resident table/W/bias.
    vmem_bytes = 4 * (2 * tm * 1            # ids tiles
                      + vp * dp             # resident table
                      + dp * hp + hp        # resident W + bias
                      + 2 * tm * dp         # embedding out tiles
                      + 2 * tm * hp)        # network out tiles
    vmem_limit = int(min(max(2 * vmem_bytes, 8 << 20), 30 << 20))

    emb_p, net_p = pl.pallas_call(
        _fused_embed_linear_relu_kernel,
        out_shape=(
            jax.ShapeDtypeStruct((n_pad, dp), jnp.float32),
            jax.ShapeDtypeStruct((n_pad, hp), jnp.float32),
        ),
        grid_spec=pltpu.PrefetchScalarGridSpec(
            num_scalar_prefetch=0,
            grid=grid,
            in_specs=[
                pl.BlockSpec((tm, 1), lambda i: (i, 0)),    # token-id tile
                pl.BlockSpec((vp, dp), lambda i: (0, 0)),   # table (resident)
                pl.BlockSpec((dp, hp), lambda i: (0, 0)),   # W     (resident)
                pl.BlockSpec((1, hp), lambda i: (0, 0)),    # bias  (resident)
            ],
            out_specs=[
                pl.BlockSpec((tm, dp), lambda i: (i, 0)),   # embedding tile
                pl.BlockSpec((tm, hp), lambda i: (i, 0)),   # network tile
            ],
        ),
        compiler_params=pltpu.CompilerParams(
            dimension_semantics=("parallel",),   # token tiles independent
            vmem_limit_bytes=vmem_limit,
        ),
    )(ids_p, table_p, w_p, b_p)

    embedded_x = emb_p[:n_tok, :emb_dim].reshape(bsz, seq, emb_dim)
    network_out = net_p[:n_tok, :hid].reshape(bsz, seq, hid)
    return embedded_x, network_out


if __name__ == "__main__":
    B, S, V, D, H = 2, 8, 32, 32, 32

    key = jax.random.PRNGKey(0)
    k_ids, k_tab, k_w, k_b = jax.random.split(key, 4)

    x_ids = jax.random.randint(k_ids, (B, S), 0, V, dtype=jnp.int32)
    table = jax.random.normal(k_tab, (V, D), dtype=jnp.float32)
    w = jax.random.normal(k_w, (D, H), dtype=jnp.float32) * 0.1
    b = jax.random.normal(k_b, (H,), dtype=jnp.float32) * 0.1

    embedded_x, net_out = jax.block_until_ready(
        embedder_network_forward(x_ids, table, w, b))

    # Pure-JAX reference for correctness.
    emb_ref = table[x_ids]                                     # (B, S, D)
    net_ref = jnp.maximum(jnp.einsum("bsd,dh->bsh", emb_ref, w) + b, 0.0)

    assert embedded_x.shape == (B, S, D) and net_out.shape == (B, S, H)
    assert jnp.allclose(embedded_x, emb_ref, atol=1e-4, rtol=1e-4)
    assert jnp.allclose(net_out, net_ref, atol=1e-4, rtol=1e-4)

    print("KERNEL_OK")
</pallas_src>

<mosaic_0001>
module attributes {stable_mosaic.version = 11 : i64} {
  func.func @_fused_embed_linear_relu_kernel(%arg0: i32, %arg1: memref<128x1xi32, #tpu.memory_space<vmem>>, %arg2: memref<32x128xf32, #tpu.memory_space<vmem>>, %arg3: memref<128x128xf32, #tpu.memory_space<vmem>>, %arg4: memref<1x128xf32, #tpu.memory_space<vmem>>, %arg5: memref<128x128xf32, #tpu.memory_space<vmem>>, %arg6: memref<128x128xf32, #tpu.memory_space<vmem>>) attributes {dimension_semantics = [#tpu.dimension_semantics<parallel>], iteration_bounds = array<i64: 1>, scalar_prefetch = 0 : i64, scratch_operands = 0 : i64, tpu.core_type = #tpu.core_type<tc>, window_params = [{transform_indices = @transform_0, window_bounds = array<i64: 128, 1>}, {pipeline_mode = #tpu.pipeline_mode<synchronous>, transform_indices = @transform_1, window_bounds = array<i64: 32, 128>}, {pipeline_mode = #tpu.pipeline_mode<synchronous>, transform_indices = @transform_2, window_bounds = array<i64: 128, 128>}, {pipeline_mode = #tpu.pipeline_mode<synchronous>, transform_indices = @transform_3, window_bounds = array<i64: 1, 128>}, {transform_indices = @transform_4, window_bounds = array<i64: 128, 128>}, {transform_indices = @transform_5, window_bounds = array<i64: 128, 128>}]} {
    %c0 = arith.constant 0 : index
    %c0_0 = arith.constant 0 : index
    %0 = vector.load %arg1[%c0, %c0_0] : memref<128x1xi32, #tpu.memory_space<vmem>>, vector<128x1xi32>
    %1 = tpu.iota {dimensions = array<i32: 1>} : vector<128x32xi32>
    %2 = vector.broadcast %0 : vector<128x1xi32> to vector<128x32xi32>
    %3 = arith.cmpi eq, %1, %2 : vector<128x32xi32>
    %4 = arith.extui %3 : vector<128x32xi1> to vector<128x32xi32>
    %5 = arith.sitofp %4 : vector<128x32xi32> to vector<128x32xf32>
    %c0_1 = arith.constant 0 : index
    %c0_2 = arith.constant 0 : index
    %6 = vector.load %arg2[%c0_1, %c0_2] : memref<32x128xf32, #tpu.memory_space<vmem>>, vector<32x128xf32>
    %cst = arith.constant dense<0.000000e+00> : vector<128x128xf32>
    %7 = tpu.matmul %5, %6, %cst {dimension_numbers = #tpu.dot_dimension_numbers<[1], [0], [0], [1], [0, 0, 1, 1], [], []>} : vector<128x32xf32>, vector<32x128xf32>, vector<128x128xf32> -> vector<128x128xf32>
    %c0_3 = arith.constant 0 : index
    %c0_4 = arith.constant 0 : index
    %8 = vector.load %arg5[%c0_3, %c0_4] : memref<128x128xf32, #tpu.memory_space<vmem>>, vector<128x128xf32>
    tpu.vector_store %arg5[%c0_3, %c0_4], %7 {strides = array<i32>} : memref<128x128xf32, #tpu.memory_space<vmem>>, vector<128x128xf32>,
    %c0_5 = arith.constant 0 : index
    %c0_6 = arith.constant 0 : index
    %9 = vector.load %arg3[%c0_5, %c0_6] : memref<128x128xf32, #tpu.memory_space<vmem>>, vector<128x128xf32>
    %cst_7 = arith.constant dense<0.000000e+00> : vector<128x128xf32>
    %10 = tpu.matmul %7, %9, %cst_7 {dimension_numbers = #tpu.dot_dimension_numbers<[1], [0], [0], [1], [0, 0, 1, 1], [], []>} : vector<128x128xf32>, vector<128x128xf32>, vector<128x128xf32> -> vector<128x128xf32>
    %c0_8 = arith.constant 0 : index
    %c0_9 = arith.constant 0 : index
    %11 = vector.load %arg4[%c0_8, %c0_9] : memref<1x128xf32, #tpu.memory_space<vmem>>, vector<1x128xf32>
    %12 = vector.broadcast %11 : vector<1x128xf32> to vector<128x128xf32>
    %13 = arith.addf %10, %12 : vector<128x128xf32>
    %cst_10 = arith.constant 0.000000e+00 : f32
    %14 = vector.broadcast %cst_10 : f32 to vector<128x128xf32>
    %15 = arith.maximumf %13, %14 : vector<128x128xf32>
    %c0_11 = arith.constant 0 : index
    %c0_12 = arith.constant 0 : index
    %16 = vector.load %arg6[%c0_11, %c0_12] : memref<128x128xf32, #tpu.memory_space<vmem>>, vector<128x128xf32>
    tpu.vector_store %arg6[%c0_11, %c0_12], %15 {strides = array<i32>} : memref<128x128xf32, #tpu.memory_space<vmem>>, vector<128x128xf32>,
    return
  }
  func.func @transform_0(%arg0: i32) -> (i32, i32) {
    %c0_i32 = arith.constant 0 : i32
    %c0_i32_0 = arith.constant 0 : i32
    return %arg0, %c0_i32 : i32, i32
  }
  func.func @transform_1(%arg0: i32) -> (i32, i32) {
    %c0_i32 = arith.constant 0 : i32
    %c0_i32_0 = arith.constant 0 : i32
    %c0_i32_1 = arith.constant 0 : i32
    return %c0_i32, %c0_i32_0 : i32, i32
  }
  func.func @transform_2(%arg0: i32) -> (i32, i32) {
    %c0_i32 = arith.constant 0 : i32
    %c0_i32_0 = arith.constant 0 : i32
    %c0_i32_1 = arith.constant 0 : i32
    return %c0_i32, %c0_i32_0 : i32, i32
  }
  func.func @transform_3(%arg0: i32) -> (i32, i32) {
    %c0_i32 = arith.constant 0 : i32
    %c0_i32_0 = arith.constant 0 : i32
    %c0_i32_1 = arith.constant 0 : i32
    return %c0_i32, %c0_i32_0 : i32, i32
  }
  func.func @transform_4(%arg0: i32) -> (i32, i32) {
    %c0_i32 = arith.constant 0 : i32
    %c0_i32_0 = arith.constant 0 : i32
    return %arg0, %c0_i32 : i32, i32
  }
  func.func @transform_5(%arg0: i32) -> (i32, i32) {
    %c0_i32 = arith.constant 0 : i32
    %c0_i32_0 = arith.constant 0 : i32
    return %arg0, %c0_i32 : i32, i32
  }
}

</mosaic_0001>

<bundles_post_ra>
// kernel: tpu_custom_call.1
= control target key start
LH: loop header
LB: loop body
LE: loop exit
PB: predicated region body
PF: predicated region fallthrough
CT: control target
= control target key end

     0   :  { %11 = vsyncpa [#allocation3], 0  ;;  %s1176_s0 = inlined_call_operand.vmem [shape: s32[128,1], index: 0, kind: input, shape index: {}]   ;;  %s1177_s1 = inlined_call_operand.hbm [shape: f32[32,128], index: 1, kind: input, shape index: {}]   ;;  %s1178_s2 = inlined_call_operand.vmem [shape: f32[128,128], index: 2, kind: input, shape index: {}]   ;;  %s1179_s3 = inlined_call_operand.vmem [shape: f32[1,128], index: 3, kind: input, shape index: {}]   ;;  %s1180_s4 = inlined_call_operand.hbm [shape: f32[128,128], index: 4, kind: output, shape index: {0}]   ;;  %s1181_s5 = inlined_call_operand.hbm [shape: f32[128,128], index: 5, kind: output, shape index: {1}]  }
   0x1   :  { %12 = vsyncpa [#allocation4], 0 }
   0x2   :  { %13 = vsyncpa [#allocation7], 0  ;;  %s876_s18 = smov [#allocation2]  }
   0x3   :  { %s21_s19 = sshll.u32 %s876_s18, 4  ;;  %s22_s19 = int_to_ptr.vmem [resolvable:$true] %s21_s19 }
   0x4   :  { %s818_s20 = scalar_lea.vmem %s22_s19, 512  ;;  %p823_p1 = scmp.lt.s32.totalorder %s22_s19, %s22_s19 }
   0x5   :  { %p819_p0 = scmp.ne.s32.totalorder %s22_s19, %s818_s20  ;;  %p824_p2 = scmp.lt.s32.totalorder %s818_s20, %s818_s20 }
   0x7   :  { %p825_p3 = por %p824_p2, %p823_p1 }
   0x9   :  { %p826_p4 = pnand %p825_p3, %p819_p0 }
   0xb   :  { %829 = shalt.err (!%p826_p4)
}
   0xc   :  { %s877_s21 = smov 128   ;;  %s878_s22 = smov 8  }
   0xd   :  { %27 = dma.hbm_to_vmem [thread:$0]  %s1177_s1, 512, %s22_s19, [#allocation3], %s877_s21, %s877_s21, %s878_s22  }
   0xe   :  { %870 = dma.done.wait [#allocation3], 512  }
   0xf   :  { %871 = vsyncadd [#allocation3], 4294966784  ;;  %v879_v0 = vmov 0   ;;  %v37_v1 = vld [vmem:[%s1176_s0 + $0x10] sm:$0xff]  ;;  %v35_v2 = vld [vmem:[%s1176_s0] sm:$0xff]  ;;  %v51_v35 = vlaneseq  ;;  %vm153_vm0 = vcmask 261120  }
  0x10   :  { %809 = vset.pattern.permute.xlu1 %v879_v0  ;;  %808 = vset.pattern.permute.xlu0 %v879_v0  ;;  %v38_v3 = vld [vmem:[%s1176_s0 + $0x18] sm:$0xff]  ;;  %v36_v4 = vld [vmem:[%s1176_s0 + $0x8] sm:$0xff]  ;;  %v151_v6 = vld [vmem:[#allocation2 + $0x10] sm:$0xff]  ;;  %v880_v39 = vmov 0.0  }
  0x11   :  { %60 = vperm.xlu1 %809, %v37_v1   ;;  %54 = vperm.xlu0 %808, %v35_v2   ;;  %v152_v5 = vld [vmem:[#allocation2 + $0x18] sm:$0xff]  ;;  %v40_v7 = vld [vmem:[%s1176_s0 + $0x28] sm:$0xff]  ;;  %v39_v8 = vld [vmem:[%s1176_s0 + $0x20] sm:$0xff]  ;;  %v1061_v36 = vand.u32 127, %v51_v35 }
  0x12   :  { %681 = vmatprep.subr.mxu0 %v152_v5  ;;  %v150_v9 = vld [vmem:[#allocation2 + $0x8] sm:$0xff]  ;;  %v42_v10 = vld [vmem:[%s1176_s0 + $0x38] sm:$0xff]  ;;  %v41_v11 = vld [vmem:[%s1176_s0 + $0x30] sm:$0xff] }
  0x13   :  { %682 = vmatpush3.msra.mxu0 %v152_v5  ;;  %v149_v12 = vld [vmem:[#allocation2] sm:$0xff]  ;;  %v44_v13 = vld [vmem:[%s1176_s0 + $0x48] sm:$0xff]  ;;  %v46_v15 = vld [vmem:[%s1176_s0 + $0x58] sm:$0xff] }
  0x14   :  { %683 = vmatprep.subr.mxu0 %v151_v6  ;;  %v43_v14 = vld [vmem:[%s1176_s0 + $0x40] sm:$0xff]  ;;  %v45_v16 = vld [vmem:[%s1176_s0 + $0x50] sm:$0xff]  ;;  %v48_v17 = vld [vmem:[%s1176_s0 + $0x68] sm:$0xff] }
  0x15   :  { %63 = vperm.xlu1 %809, %v38_v3   ;;  %57 = vperm.xlu0 %808, %v36_v4   ;;  %v47_v18 = vld [vmem:[%s1176_s0 + $0x60] sm:$0xff]  ;;  %v50_v19 = vld [vmem:[%s1176_s0 + $0x78] sm:$0xff]  ;;  %v49_v20 = vld [vmem:[%s1176_s0 + $0x70] sm:$0xff] }
  0x16   :  { %684 = vmatpush3.msra.mxu0 %v151_v6  ;;  %v378_v21 = vld [vmem:[%s1178_s2 + $0x78] sm:$0xff]  ;;  %v973_v22 = vld [vmem:[%s1178_s2 + $0x70] sm:$0xff]  ;;  %v979_v23 = vld [vmem:[%s1178_s2 + $0x68] sm:$0xff] }
  0x17   :  { %685 = vmatprep.subr.mxu0 %v150_v9  ;;  %769 = vmatprep.subr.mxu1 %v378_v21  ;;  %v986_v24 = vld [vmem:[%s1178_s2 + $0x60] sm:$0xff]  ;;  %v993_v25 = vld [vmem:[%s1178_s2 + $0x58] sm:$0xff]  ;;  %v1000_v26 = vld [vmem:[%s1178_s2 + $0x50] sm:$0xff] }
  0x18   :  { %686 = vmatpush3.msra.mxu0 %v150_v9  ;;  %785 = vmatpush3.msra.mxu1 %v378_v21  ;;  %v1007_v27 = vld [vmem:[%s1178_s2 + $0x48] sm:$0xff]  ;;  %v1014_v28 = vld [vmem:[%s1178_s2 + $0x40] sm:$0xff]  ;;  %v1021_v29 = vld [vmem:[%s1178_s2 + $0x38] sm:$0xff] }
  0x19   :  { %69 = vperm.xlu1 %809, %v40_v7   ;;  %66 = vperm.xlu0 %808, %v39_v8   ;;  %v1028_v30 = vld [vmem:[%s1178_s2 + $0x30] sm:$0xff]  ;;  %v1035_v31 = vld [vmem:[%s1178_s2 + $0x28] sm:$0xff]  ;;  %v1042_v32 = vld [vmem:[%s1178_s2 + $0x20] sm:$0xff] }
  0x1a   :  { %687 = vmatprep.subr.mxu0 %v149_v12  ;;  %770 = vmatprep.subr.mxu1 %v973_v22  ;;  %v1049_v33 = vld [vmem:[%s1178_s2 + $0x18] sm:$0xff]  ;;  %v1056_v34 = vld [vmem:[%s1178_s2 + $0x10] sm:$0xff]  ;;  %v364_v6 = vld [vmem:[%s1178_s2 + $0x8] sm:$0xff] }
  0x1b   :  { %688 = vmatpush3.msra.mxu0 %v149_v12  ;;  %786 = vmatpush3.msra.mxu1 %v973_v22  ;;  %v363_v7 = vld [vmem:[%s1178_s2] sm:$0xff]  ;;  %s881_s2 = smov [#allocation5]  }
  0x1c   :  { %713 = vmatprep.subr.mxu0 %v378_v21  ;;  %771 = vmatprep.subr.mxu1 %v979_v23  ;;  %s568_s13 = sshll.u32 %s881_s2, 4  ;;  %s569_s13 = int_to_ptr.vmem [resolvable:$true] %s568_s13 }
  0x1d   :  { %75 = vperm.xlu1 %809, %v42_v10   ;;  %72 = vperm.xlu0 %808, %v41_v11   ;;  %s830_s14 = scalar_lea.vmem %s569_s13, 2048  ;;  %p835_p6 = scmp.lt.s32.totalorder %s569_s13, %s569_s13 }
  0x1e   :  { %787 = vmatpush3.msra.mxu1 %v979_v23  ;;  %p831_p5 = scmp.ne.s32.totalorder %s569_s13, %s830_s14  ;;  %p836_p7 = scmp.lt.s32.totalorder %s830_s14, %s830_s14 }
  0x1f   :  { %772 = vmatprep.subr.mxu1 %v986_v24 }
  0x20   :  { %788 = vmatpush3.msra.mxu1 %v986_v24  ;;  %p837_p8 = por %p836_p7, %p835_p6 }
  0x21   :  { %81 = vperm.xlu1 %809, %v44_v13   ;;  %78 = vperm.xlu0 %808, %v43_v14  }
  0x22   :  { %773 = vmatprep.subr.mxu1 %v993_v25  ;;  %p838_p9 = pnand %p837_p8, %p831_p5 }
  0x23   :  { %789 = vmatpush3.msra.mxu1 %v993_v25 }
  0x24   :  { %774 = vmatprep.subr.mxu1 %v1000_v26 }
  0x25   :  { %87 = vperm.xlu1 %809, %v46_v15   ;;  %84 = vperm.xlu0 %808, %v45_v16  }
  0x26   :  { %790 = vmatpush3.msra.mxu1 %v1000_v26 }
  0x27   :  { %775 = vmatprep.subr.mxu1 %v1007_v27 }
  0x28   :  { %791 = vmatpush3.msra.mxu1 %v1007_v27 }
  0x29   :  { %93 = vperm.xlu1 %809, %v48_v17   ;;  %90 = vperm.xlu0 %808, %v47_v18  }
  0x2a   :  { %776 = vmatprep.subr.mxu1 %v1014_v28 }
  0x2b   :  { %792 = vmatpush3.msra.mxu1 %v1014_v28 }
  0x2c   :  { %777 = vmatprep.subr.mxu1 %v1021_v29 }
  0x2d   :  { %99 = vperm.xlu1 %809, %v50_v19   ;;  %96 = vperm.xlu0 %808, %v49_v20  }
  0x2e   :  { %793 = vmatpush3.msra.mxu1 %v1021_v29 }
  0x2f   :  { %778 = vmatprep.subr.mxu1 %v1028_v30 }
  0x30   :  { %794 = vmatpush3.msra.mxu1 %v1028_v30 }
  0x31   :  { %779 = vmatprep.subr.mxu1 %v1035_v31 }
  0x32   :  { %795 = vmatpush3.msra.mxu1 %v1035_v31 }
  0x33   :  { %780 = vmatprep.subr.mxu1 %v1042_v32 }
  0x34   :  { %796 = vmatpush3.msra.mxu1 %v1042_v32 }
  0x35   :  { %781 = vmatprep.subr.mxu1 %v1049_v33 }
  0x36   :  { %797 = vmatpush3.msra.mxu1 %v1049_v33 }
  0x37   :  { %782 = vmatprep.subr.mxu1 %v1056_v34 }
  0x38   :  { %798 = vmatpush3.msra.mxu1 %v1056_v34 }
  0x39   :  { %783 = vmatprep.subr.mxu1 %v364_v6 }
  0x3a   :  { %799 = vmatpush3.msra.mxu1 %v364_v6 }
  0x3b   :  { %784 = vmatprep.subr.mxu1 %v363_v7 }
  0x3c   :  { %800 = vmatpush3.msra.mxu1 %v363_v7 }
  0x8c   :  { %v61_v37 = vpop.permute.xlu1 %60  ;;  %v55_v38 = vpop.permute.xlu0 %54 }
  0x8d   :  { %vm101_vm1 = vcmp.eq.s32.totalorder %v1061_v36, %v55_v38  ;;  %vm103_vm2 = vcmp.eq.s32.totalorder %v1061_v36, %v61_v37 }
  0x8e   :  { %v596_v40 = vsel %vm101_vm1, 1.0, %v880_v39  ;;  %v598_v43 = vsel %vm103_vm2, 1.0, %v880_v39 }
  0x8f   :  { %689 = vmatprep.mubr.msk.f32.mxu0 %vm153_vm0, %v596_v40 }
  0x90   :  { %v64_v41 = vpop.permute.xlu1 %63  ;;  %v58_v42 = vpop.permute.xlu0 %57 }
  0x91   :  { %vm102_vm3 = vcmp.eq.s32.totalorder %v1061_v36, %v58_v42  ;;  %vm104_vm4 = vcmp.eq.s32.totalorder %v1061_v36, %v64_v41 }
  0x92   :  { %v597_v44 = vsel %vm102_vm3, 1.0, %v880_v39  ;;  %v599_v47 = vsel %vm104_vm4, 1.0, %v880_v39 }
  0x93   :  { %690 = vmatmul.mubr.msk.f32.vlgmr.msra.gmra.mxu0 %vm153_vm0, %v597_v44 }
  0x94   :  { %v70_v45 = vpop.permute.xlu1 %69  ;;  %692 = vmatprep.mubr.msk.f32.mxu0 %vm153_vm0, %v598_v43  ;;  %v67_v46 = vpop.permute.xlu0 %66  ;;  %714 = vmatpush3.msra.mxu0 %v378_v21 }
  0x95   :  { %vm105_vm5 = vcmp.eq.s32.totalorder %v1061_v36, %v67_v46  ;;  %715 = vmatprep.subr.mxu0 %v973_v22  ;;  %vm106_vm6 = vcmp.eq.s32.totalorder %v1061_v36, %v70_v45 }
  0x96   :  { %v600_v48 = vsel %vm105_vm5, 1.0, %v880_v39  ;;  %716 = vmatpush3.msra.mxu0 %v973_v22  ;;  %v601_v51 = vsel %vm106_vm6, 1.0, %v880_v39 }
  0x97   :  { %693 = vmatmul.mubr.msk.f32.gmra.mxu0 %vm153_vm0, %v599_v47  ;;  %717 = vmatprep.subr.mxu0 %v979_v23 }
  0x98   :  { %v76_v49 = vpop.permute.xlu1 %75  ;;  %695 = vmatprep.mubr.msk.f32.mxu0 %vm153_vm0, %v600_v48  ;;  %v73_v50 = vpop.permute.xlu0 %72  ;;  %718 = vmatpush3.msra.mxu0 %v979_v23 }
  0x99   :  { %vm107_vm7 = vcmp.eq.s32.totalorder %v1061_v36, %v73_v50  ;;  %719 = vmatprep.subr.mxu0 %v986_v24  ;;  %vm108_vm8 = vcmp.eq.s32.totalorder %v1061_v36, %v76_v49 }
  0x9a   :  { %v602_v52 = vsel %vm107_vm7, 1.0, %v880_v39  ;;  %720 = vmatpush3.msra.mxu0 %v986_v24  ;;  %v603_v55 = vsel %vm108_vm8, 1.0, %v880_v39 }
  0x9b   :  { %696 = vmatmul.mubr.msk.f32.gmra.mxu0 %vm153_vm0, %v601_v51  ;;  %721 = vmatprep.subr.mxu0 %v993_v25 }
  0x9c   :  { %v82_v53 = vpop.permute.xlu1 %81  ;;  %698 = vmatprep.mubr.msk.f32.mxu0 %vm153_vm0, %v602_v52  ;;  %v79_v54 = vpop.permute.xlu0 %78  ;;  %722 = vmatpush3.msra.mxu0 %v993_v25 }
  0x9d   :  { %vm109_vm9 = vcmp.eq.s32.totalorder %v1061_v36, %v79_v54  ;;  %723 = vmatprep.subr.mxu0 %v1000_v26  ;;  %vm110_vm10 = vcmp.eq.s32.totalorder %v1061_v36, %v82_v53 }
  0x9e   :  { %v604_v56 = vsel %vm109_vm9, 1.0, %v880_v39  ;;  %724 = vmatpush3.msra.mxu0 %v1000_v26  ;;  %v605_v59 = vsel %vm110_vm10, 1.0, %v880_v39 }
  0x9f   :  { %699 = vmatmul.mubr.msk.f32.gmra.mxu0 %vm153_vm0, %v603_v55  ;;  %725 = vmatprep.subr.mxu0 %v1007_v27 }
  0xa0   :  { %v88_v57 = vpop.permute.xlu1 %87  ;;  %701 = vmatprep.mubr.msk.f32.mxu0 %vm153_vm0, %v604_v56  ;;  %v85_v58 = vpop.permute.xlu0 %84  ;;  %726 = vmatpush3.msra.mxu0 %v1007_v27 }
  0xa1   :  { %vm111_vm11 = vcmp.eq.s32.totalorder %v1061_v36, %v85_v58  ;;  %727 = vmatprep.subr.mxu0 %v1014_v28  ;;  %vm112_vm12 = vcmp.eq.s32.totalorder %v1061_v36, %v88_v57 }
  0xa2   :  { %v606_v60 = vsel %vm111_vm11, 1.0, %v880_v39  ;;  %728 = vmatpush3.msra.mxu0 %v1014_v28  ;;  %v607_v63 = vsel %vm112_vm12, 1.0, %v880_v39 }
  0xa3   :  { %702 = vmatmul.mubr.msk.f32.gmra.mxu0 %vm153_vm0, %v605_v59  ;;  %729 = vmatprep.subr.mxu0 %v1021_v29 }
  0xa4   :  { %v94_v61 = vpop.permute.xlu1 %93  ;;  %704 = vmatprep.mubr.msk.f32.mxu0 %vm153_vm0, %v606_v60  ;;  %v91_v62 = vpop.permute.xlu0 %90  ;;  %730 = vmatpush3.msra.mxu0 %v1021_v29 }
  0xa5   :  { %vm113_vm13 = vcmp.eq.s32.totalorder %v1061_v36, %v91_v62  ;;  %731 = vmatprep.subr.mxu0 %v1028_v30  ;;  %vm114_vm14 = vcmp.eq.s32.totalorder %v1061_v36, %v94_v61 }
  0xa6   :  { %v608_v0 = vsel %vm113_vm13, 1.0, %v880_v39  ;;  %732 = vmatpush3.msra.mxu0 %v1028_v30  ;;  %v609_v3 = vsel %vm114_vm14, 1.0, %v880_v39 }
  0xa7   :  { %705 = vmatmul.mubr.msk.f32.gmra.mxu0 %vm153_vm0, %v607_v63  ;;  %733 = vmatprep.subr.mxu0 %v1035_v31 }
  0xa8   :  { %v100_v1 = vpop.permute.xlu1 %99  ;;  %707 = vmatprep.mubr.msk.f32.mxu0 %vm153_vm0, %v608_v0  ;;  %v97_v2 = vpop.permute.xlu0 %96  ;;  %734 = vmatpush3.msra.mxu0 %v1035_v31 }
  0xa9   :  { %vm115_vm15 = vcmp.eq.s32.totalorder %v1061_v36, %v97_v2  ;;  %735 = vmatprep.subr.mxu0 %v1042_v32  ;;  %vm116_vm1 = vcmp.eq.s32.totalorder %v1061_v36, %v100_v1 }
  0xaa   :  { %v610_v4 = vsel %vm115_vm15, 1.0, %v880_v39  ;;  %736 = vmatpush3.msra.mxu0 %v1042_v32  ;;  %v611_v5 = vsel %vm116_vm1, 1.0, %v880_v39 }
  0xab   :  { %708 = vmatmul.mubr.msk.f32.gmra.mxu0 %vm153_vm0, %v609_v3  ;;  %737 = vmatprep.subr.mxu0 %v1049_v33 }
  0xac   :  { %710 = vmatprep.mubr.msk.f32.mxu0 %vm153_vm0, %v610_v4  ;;  %738 = vmatpush3.msra.mxu0 %v1049_v33 }
  0xad   :  { %739 = vmatprep.subr.mxu0 %v1056_v34 }
  0xae   :  { %740 = vmatpush3.msra.mxu0 %v1056_v34 }
  0xaf   :  { %711 = vmatmul.mubr.msk.f32.gmra.mxu0 %vm153_vm0, %v611_v5  ;;  %741 = vmatprep.subr.mxu0 %v364_v6 }
  0xb0   :  { %742 = vmatpush3.msra.mxu0 %v364_v6 }
  0xb1   :  { %743 = vmatprep.subr.mxu0 %v363_v7 }
  0xb2   :  { %744 = vmatpush3.msra.mxu0 %v363_v7 }
 0x153   :  { %v691_v8 = vpop.f32.mrf.mxu0 }
 0x154   :  { %348 = vst [vmem:[#allocation5 + $0x8] sm:$0xff] %v691_v8 }
 0x155   :  { %v268_v9 = vpop.f32.mrf.mxu0 }
 0x156   :  { %347 = vst [vmem:[#allocation5] sm:$0xff] %v268_v9  ;;  %745 = vmatprep.mubr.f32.mxu0 %v268_v9 }
 0x157   :  { %v694_v10 = vpop.f32.mrf.mxu0  ;;  %746 = vmatmul.mubr.f32.vlgmr.msra.gmra.mxu0 %v691_v8 }
 0x158   :  { %350 = vst [vmem:[#allocation5 + $0x18] sm:$0xff] %v694_v10 }
 0x159   :  { %v278_v11 = vpop.f32.mrf.mxu0 }
 0x15a   :  { %349 = vst [vmem:[#allocation5 + $0x10] sm:$0xff] %v278_v11  ;;  %748 = vmatprep.mubr.f32.mxu0 %v278_v11 }
 0x15b   :  { %v697_v12 = vpop.f32.mrf.mxu0  ;;  %749 = vmatmul.mubr.f32.gmra.mxu0 %v694_v10 }
 0x15c   :  { %352 = vst [vmem:[#allocation5 + $0x28] sm:$0xff] %v697_v12 }
 0x15d   :  { %v288_v13 = vpop.f32.mrf.mxu0 }
 0x15e   :  { %351 = vst [vmem:[#allocation5 + $0x20] sm:$0xff] %v288_v13  ;;  %751 = vmatprep.mubr.f32.mxu0 %v288_v13 }
 0x15f   :  { %v700_v14 = vpop.f32.mrf.mxu0  ;;  %752 = vmatmul.mubr.f32.gmra.mxu0 %v697_v12 }
 0x160   :  { %354 = vst [vmem:[#allocation5 + $0x38] sm:$0xff] %v700_v14 }
 0x161   :  { %v298_v15 = vpop.f32.mrf.mxu0 }
 0x162   :  { %353 = vst [vmem:[#allocation5 + $0x30] sm:$0xff] %v298_v15  ;;  %754 = vmatprep.mubr.f32.mxu1 %v298_v15 }
 0x163   :  { %v703_v16 = vpop.f32.mrf.mxu0  ;;  %755 = vmatmul.mubr.f32.vlgmr.msra.gmra.mxu1 %v700_v14 }
 0x164   :  { %356 = vst [vmem:[#allocation5 + $0x48] sm:$0xff] %v703_v16 }
 0x165   :  { %v308_v17 = vpop.f32.mrf.mxu0 }
 0x166   :  { %355 = vst [vmem:[#allocation5 + $0x40] sm:$0xff] %v308_v17  ;;  %757 = vmatprep.mubr.f32.mxu1 %v308_v17 }
 0x167   :  { %v706_v18 = vpop.f32.mrf.mxu0  ;;  %758 = vmatmul.mubr.f32.gmra.mxu1 %v703_v16 }
 0x168   :  { %358 = vst [vmem:[#allocation5 + $0x58] sm:$0xff] %v706_v18 }
 0x169   :  { %v318_v19 = vpop.f32.mrf.mxu0 }
 0x16a   :  { %357 = vst [vmem:[#allocation5 + $0x50] sm:$0xff] %v318_v19  ;;  %760 = vmatprep.mubr.f32.mxu1 %v318_v19 }
 0x16b   :  { %v709_v20 = vpop.f32.mrf.mxu0  ;;  %761 = vmatmul.mubr.f32.gmra.mxu1 %v706_v18 }
 0x16c   :  { %360 = vst [vmem:[#allocation5 + $0x68] sm:$0xff] %v709_v20 }
 0x16d   :  { %v328_v21 = vpop.f32.mrf.mxu0 }
 0x16e   :  { %359 = vst [vmem:[#allocation5 + $0x60] sm:$0xff] %v328_v21  ;;  %763 = vmatprep.mubr.f32.mxu1 %v328_v21 }
 0x16f   :  { %v712_v22 = vpop.f32.mrf.mxu0  ;;  %764 = vmatmul.mubr.f32.gmra.mxu1 %v709_v20 }
 0x170   :  { %362 = vst [vmem:[#allocation5 + $0x78] sm:$0xff] %v712_v22 }
 0x171   :  { %v338_v23 = vpop.f32.mrf.mxu0 }
 0x172   :  { %361 = vst [vmem:[#allocation5 + $0x70] sm:$0xff] %v338_v23  ;;  %766 = vmatprep.mubr.f32.mxu1 %v338_v23 }
 0x173   :  { %767 = vmatmul.mubr.f32.gmra.mxu1 %v712_v22 }
 0x174   :  { %841 = shalt.err (!%p838_p9)
}
 0x175   :  { %574 = dma.vmem_to_hbm [thread:$0]  %s569_s13, 2048, %s1180_s4, [#allocation4], %s877_s21, %s877_s21, %s878_s22  }
 0x176   :  { %v1152_v24 = vld [vmem:[%s1179_s3] ss:$0 sm:$0xff]  ;;  %s882_s3 = smov [#allocation6]  }
 0x177   :  { %s580_s4 = sshll.u32 %s882_s3, 4  ;;  %s581_s4 = int_to_ptr.vmem [resolvable:$true] %s580_s4 }
 0x178   :  { %s850_s19 = scalar_lea.vmem %s581_s4, 2048  ;;  %p855_p11 = scmp.lt.s32.totalorder %s581_s4, %s581_s4 }
 0x179   :  { %p851_p10 = scmp.ne.s32.totalorder %s581_s4, %s850_s19  ;;  %p856_p12 = scmp.lt.s32.totalorder %s850_s19, %s850_s19 }
 0x17b   :  { %p857_p13 = por %p856_p12, %p855_p11 }
 0x17d   :  { %p858_p0 = pnand %p857_p13, %p851_p10 }
 0x217   :  { %v747_v25 = vpop.f32.mrf.mxu0 }
 0x218   :  { %v458_v26 = vadd.f32 %v747_v25, %v1152_v24 }
 0x219   :  { %v452_v27 = vpop.f32.mrf.mxu0 }
 0x21a   :  { %v532_v28 = vmax.f32 %v458_v26, 0.0  ;;  %v453_v29 = vadd.f32 %v1152_v24, %v452_v27 }
 0x21b   :  { %v750_v30 = vpop.f32.mrf.mxu0 }
 0x21c   :  { %548 = vst [vmem:[#allocation6 + $0x8] sm:$0xff] %v532_v28  ;;  %v531_v31 = vmax.f32 %v453_v29, 0.0  ;;  %v468_v32 = vadd.f32 %v750_v30, %v1152_v24 }
 0x21d   :  { %v462_v33 = vpop.f32.mrf.mxu0 }
 0x21e   :  { %547 = vst [vmem:[#allocation6] sm:$0xff] %v531_v31  ;;  %v534_v34 = vmax.f32 %v468_v32, 0.0  ;;  %v463_v35 = vadd.f32 %v1152_v24, %v462_v33 }
 0x21f   :  { %v753_v36 = vpop.f32.mrf.mxu0 }
 0x220   :  { %550 = vst [vmem:[#allocation6 + $0x18] sm:$0xff] %v534_v34  ;;  %v533_v37 = vmax.f32 %v463_v35, 0.0  ;;  %v478_v38 = vadd.f32 %v753_v36, %v1152_v24 }
 0x221   :  { %v472_v39 = vpop.f32.mrf.mxu0 }
 0x222   :  { %549 = vst [vmem:[#allocation6 + $0x10] sm:$0xff] %v533_v37  ;;  %v536_v40 = vmax.f32 %v478_v38, 0.0  ;;  %v473_v41 = vadd.f32 %v1152_v24, %v472_v39 }
 0x223   :  { %v756_v42 = vpop.f32.mrf.mxu1 }
 0x224   :  { %552 = vst [vmem:[#allocation6 + $0x28] sm:$0xff] %v536_v40  ;;  %v535_v43 = vmax.f32 %v473_v41, 0.0  ;;  %v488_v44 = vadd.f32 %v756_v42, %v1152_v24 }
 0x225   :  { %v482_v45 = vpop.f32.mrf.mxu1 }
 0x226   :  { %551 = vst [vmem:[#allocation6 + $0x20] sm:$0xff] %v535_v43  ;;  %v538_v46 = vmax.f32 %v488_v44, 0.0  ;;  %v483_v47 = vadd.f32 %v1152_v24, %v482_v45 }
 0x227   :  { %v759_v48 = vpop.f32.mrf.mxu1 }
 0x228   :  { %554 = vst [vmem:[#allocation6 + $0x38] sm:$0xff] %v538_v46  ;;  %v537_v49 = vmax.f32 %v483_v47, 0.0  ;;  %v498_v50 = vadd.f32 %v759_v48, %v1152_v24 }
 0x229   :  { %v492_v51 = vpop.f32.mrf.mxu1 }
 0x22a   :  { %553 = vst [vmem:[#allocation6 + $0x30] sm:$0xff] %v537_v49  ;;  %v540_v52 = vmax.f32 %v498_v50, 0.0  ;;  %v493_v53 = vadd.f32 %v1152_v24, %v492_v51 }
 0x22b   :  { %v762_v54 = vpop.f32.mrf.mxu1 }
 0x22c   :  { %556 = vst [vmem:[#allocation6 + $0x48] sm:$0xff] %v540_v52  ;;  %v539_v55 = vmax.f32 %v493_v53, 0.0  ;;  %v508_v56 = vadd.f32 %v762_v54, %v1152_v24 }
 0x22d   :  { %v502_v57 = vpop.f32.mrf.mxu1 }
 0x22e   :  { %555 = vst [vmem:[#allocation6 + $0x40] sm:$0xff] %v539_v55  ;;  %v542_v58 = vmax.f32 %v508_v56, 0.0  ;;  %v503_v59 = vadd.f32 %v1152_v24, %v502_v57 }
 0x22f   :  { %v765_v60 = vpop.f32.mrf.mxu1 }
 0x230   :  { %558 = vst [vmem:[#allocation6 + $0x58] sm:$0xff] %v542_v58  ;;  %v541_v61 = vmax.f32 %v503_v59, 0.0  ;;  %v518_v62 = vadd.f32 %v765_v60, %v1152_v24 }
 0x231   :  { %v512_v63 = vpop.f32.mrf.mxu1 }
 0x232   :  { %557 = vst [vmem:[#allocation6 + $0x50] sm:$0xff] %v541_v61  ;;  %v544_v0 = vmax.f32 %v518_v62, 0.0  ;;  %v513_v1 = vadd.f32 %v1152_v24, %v512_v63 }
 0x233   :  { %v768_v2 = vpop.f32.mrf.mxu1 }
 0x234   :  { %560 = vst [vmem:[#allocation6 + $0x68] sm:$0xff] %v544_v0  ;;  %v543_v3 = vmax.f32 %v513_v1, 0.0  ;;  %v528_v4 = vadd.f32 %v768_v2, %v1152_v24 }
 0x235   :  { %v522_v5 = vpop.f32.mrf.mxu1 }
 0x236   :  { %559 = vst [vmem:[#allocation6 + $0x60] sm:$0xff] %v543_v3  ;;  %v546_v6 = vmax.f32 %v528_v4, 0.0  ;;  %v523_v7 = vadd.f32 %v1152_v24, %v522_v5 }
 0x238   :  { %562 = vst [vmem:[#allocation6 + $0x78] sm:$0xff] %v546_v6  ;;  %v545_v8 = vmax.f32 %v523_v7, 0.0 }
 0x23a   :  { %561 = vst [vmem:[#allocation6 + $0x70] sm:$0xff] %v545_v8 }
 0x23b   :  { %861 = shalt.err (!%p858_p0)
}
 0x23c   :  { %586 = dma.vmem_to_hbm [thread:$0]  %s581_s4, 2048, %s1181_s5, [#allocation7], %s877_s21, %s877_s21, %s878_s22  }
 0x23d   :  { %872 = dma.done.wait [#allocation4], 2048  }
 0x23e   :  { %873 = vsyncadd [#allocation4], 4294965248 }
 0x23f   :  { %874 = dma.done.wait [#allocation7], 2048  }
 0x240   :  { %875 = vsyncadd [#allocation7], 4294965248 }
 0x241   :  { %593 = vsyncpa [#allocation3], 1 }
 0x242   :  { %594 = vsyncpa [#allocation4], 1 }
 0x243   :  { %595 = vsyncpa [#allocation7], 1 }

</bundles_post_ra>
